<compile_context>
chip_gen: v7x
topology: tpu7x:2x2x1
jax: 0.10.0
libtpu: 0.0.40
codegen_flags: <defaults>
</compile_context>

<pallas_src>
import math
from functools import partial

import jax
import jax.numpy as jnp
import numpy as np
from jax.experimental import pallas as pl
from jax.experimental.pallas import tpu as pltpu


# ----------------------------------------------------------------------------
# Generation-aware scoped-VMEM limit: half of physical VMEM, capped at 64 MiB
# (v5e/v6e: 128 MiB per core -> 64 MiB; v7x: 64 MiB per TC -> 32 MiB).
# ----------------------------------------------------------------------------
def _vmem_limit_bytes():
    try:
        cap = int(pltpu.get_tpu_info().vmem_capacity_bytes)
    except Exception:
        cap = 128 * 1024 * 1024
    return int(min(64 * 1024 * 1024, cap // 2))


# ----------------------------------------------------------------------------
# One-time parameter prep (hoisted out of the per-call forward):
#   * fuse wq/wk/wv -> [H, 3H], bq/bk/bv -> [1, 3H]
#   * fold the 1/sqrt(head_dim) attention scale into the query columns
#   * optionally pre-cast the fused weight to bf16 (no in-kernel weight cast)
# ----------------------------------------------------------------------------
def prepare_attention_params(params, num_heads, *, use_bf16=False):
    H = params["wq"].shape[0]
    d = H // num_heads
    scale = 1.0 / math.sqrt(d)
    w_qkv = jnp.concatenate(
        [params["wq"] * scale, params["wk"], params["wv"]], axis=1)
    b_qkv = jnp.concatenate(
        [params["bq"] * scale, params["bk"], params["bv"]], axis=1)
    if use_bf16:
        w_qkv = w_qkv.astype(jnp.bfloat16)   # bias stays f32 (added to f32 acc)
    return {"w_qkv": w_qkv, "b_qkv": b_qkv}


# ----------------------------------------------------------------------------
# Kernel 1: fused Q/K/V projection.
#   x tile: [TN, H]; w_qkv: [H, 3H] (resident); b_qkv: [1, 3H] (resident)
#   outputs: q / k / v tiles, [TN, H] each (bf16 when use_bf16).
# ----------------------------------------------------------------------------
def qkv_proj_kernel(x_ref, w_ref, b_ref, q_ref, k_ref, v_ref, *,
                    hidden, use_bf16):
    x = x_ref[...]
    if use_bf16:
        x = x.astype(jnp.bfloat16)           # per-tile activation cast only
    acc = jnp.dot(x, w_ref[...], preferred_element_type=jnp.float32)
    acc = acc + b_ref[...]
    q_ref[...] = acc[:, :hidden].astype(q_ref.dtype)
    k_ref[...] = acc[:, hidden:2 * hidden].astype(k_ref.dtype)
    v_ref[...] = acc[:, 2 * hidden:].astype(v_ref.dtype)


def _pick_row_tile(N, row_tile):
    if N > row_tile:
        return max(8, (row_tile // 8) * 8)
    # Give the "parallel" row axis >= 2 steps (v7x has 2 TensorCores) when the
    # split stays sublane-aligned and each tile remains reasonably large.
    half = N // 2
    if N >= 256 and half % 8 == 0:
        return half
    return N


def qkv_projection(x2d, w_qkv, b_qkv, *, use_bf16=False, row_tile=512):
    N, H = x2d.shape
    H3 = w_qkv.shape[1]
    tn = _pick_row_tile(N, row_tile)
    grid = (pl.cdiv(N, tn),)

    out_dtype = jnp.bfloat16 if use_bf16 else jnp.float32
    out_sds = jax.ShapeDtypeStruct((N, H), out_dtype)
    kernel = partial(qkv_proj_kernel, hidden=H, use_bf16=use_bf16)
    cparams = pltpu.CompilerParams(
        dimension_semantics=("parallel",),
        vmem_limit_bytes=_vmem_limit_bytes(),
    )

    def build(single_buffer):
        if single_buffer:
            # Constant index_map -> weight/bias never change; a second buffer
            # would be dead VMEM (matters most on v7x's 64 MiB per TC).
            w_spec = pl.BlockSpec((H, H3), lambda i: (0, 0),
                                  pipeline_mode=pl.Buffered(buffer_count=1))
            b_spec = pl.BlockSpec((1, H3), lambda i: (0, 0),
                                  pipeline_mode=pl.Buffered(buffer_count=1))
        else:
            w_spec = pl.BlockSpec((H, H3), lambda i: (0, 0))
            b_spec = pl.BlockSpec((1, H3), lambda i: (0, 0))
        return pl.pallas_call(
            kernel,
            out_shape=(out_sds, out_sds, out_sds),
            grid=grid,
            in_specs=[pl.BlockSpec((tn, H), lambda i: (i, 0)), w_spec, b_spec],
            out_specs=(
                pl.BlockSpec((tn, H), lambda i: (i, 0)),
                pl.BlockSpec((tn, H), lambda i: (i, 0)),
                pl.BlockSpec((tn, H), lambda i: (i, 0)),
            ),
            compiler_params=cparams,
        )

    try:
        return build(True)(x2d, w_qkv, b_qkv)
    except Exception:
        # Fallback for JAX versions where pipeline_mode / Buffered(1) is not
        # accepted on a top-level pallas_call BlockSpec.
        return build(False)(x2d, w_qkv, b_qkv)


# ----------------------------------------------------------------------------
# Kernel 2: attention over a (batch, head-group) grid.
#   q/k/v blocks: [1, S, hpb*d] slices of the [B, S, H] projections
#   mask block:   [1, 1, 1, S]
#   out block:    [1, S, hpb*d] slice of the merged [B, S, H] context
# Q is pre-scaled by 1/sqrt(d); softmax normalization is deferred to the
# [S, d] context (S^2 -> S*d VALU work per head).
# ----------------------------------------------------------------------------
def attention_kernel(q_ref, k_ref, v_ref, mask_ref, o_ref, *,
                     head_dim, heads_per_block, use_bf16):
    q_blk = q_ref[0]                       # [S, hpb*d] (already 1/sqrt(d)-scaled)
    k_blk = k_ref[0]
    v_blk = v_ref[0]
    mask_b = mask_ref[0, 0, 0][None, :]    # [1, S] additive mask (hoisted)

    ctx_parts = []
    for h in range(heads_per_block):       # small static unroll over heads
        lo = h * head_dim
        hi = lo + head_dim
        q_h = q_blk[:, lo:hi]
        k_h = k_blk[:, lo:hi]
        v_h = v_blk[:, lo:hi]

        # q @ k^T: contract the head dim directly (no explicit transpose).
        scores = jax.lax.dot_general(
            q_h, k_h, (((1,), (1,)), ((), ())),
            preferred_element_type=jnp.float32)
        scores = scores + mask_b

        # numerically-stable softmax, normalization deferred past the PV dot
        m = jnp.max(scores, axis=-1, keepdims=True)
        e = jnp.exp(scores - m)
        denom = jnp.sum(e, axis=-1, keepdims=True)
        # TODO(synk): attention dropout is identity in eval mode; training
        # dropout would use pltpu.prng_seed / pltpu.prng_random_bits.
        if use_bf16:
            inv = pl.reciprocal(denom, approx=True)   # EUP slot, ~free
            pv = jnp.dot(e.astype(jnp.bfloat16), v_h,
                         preferred_element_type=jnp.float32)
        else:
            inv = 1.0 / denom                          # exact f32 parity path
            pv = jnp.dot(e, v_h, preferred_element_type=jnp.float32)
        ctx_parts.append(pv * inv)

    ctx = ctx_parts[0] if len(ctx_parts) == 1 else jnp.concatenate(
        ctx_parts, axis=-1)
    o_ref[0] = ctx.astype(o_ref.dtype)     # single lane-dense store


def _pick_heads_per_block(num_heads, head_dim):
    # Smallest head group whose lane width is a multiple of 128 (lane-dense
    # loads / stores); otherwise take all heads (block == full hidden dim).
    for hpb in range(1, num_heads):
        if num_heads % hpb == 0 and (hpb * head_dim) % 128 == 0:
            return hpb
    return num_heads


def multi_head_attention(q3, k3, v3, mask, *, num_heads, use_bf16=False):
    B, S, H = q3.shape
    d = H // num_heads
    hpb = _pick_heads_per_block(num_heads, d)
    n_groups = num_heads // hpb
    blk = hpb * d

    qkv_spec = pl.BlockSpec((1, S, blk), lambda b, g: (b, 0, g))
    mask_spec = pl.BlockSpec((1, 1, 1, S), lambda b, g: (b, 0, 0, 0))
    out_spec = pl.BlockSpec((1, S, blk), lambda b, g: (b, 0, g))

    kernel = partial(attention_kernel, head_dim=d, heads_per_block=hpb,
                     use_bf16=use_bf16)
    return pl.pallas_call(
        kernel,
        out_shape=jax.ShapeDtypeStruct((B, S, H), jnp.float32),
        grid=(B, n_groups),
        in_specs=[qkv_spec, qkv_spec, qkv_spec, mask_spec],
        out_specs=out_spec,
        compiler_params=pltpu.CompilerParams(
            dimension_semantics=("parallel", "parallel"),
            vmem_limit_bytes=_vmem_limit_bytes(),
        ),
    )(q3, k3, v3, mask)


# ----------------------------------------------------------------------------
# Module-level forward (only free reshapes around the two Pallas kernels).
# Expects params already fused/scaled by prepare_attention_params.
# ----------------------------------------------------------------------------
def bert_self_attention_forward(hidden_states, attention_mask, fused_params,
                                num_heads, *, use_bf16=False, row_tile=512):
    B, S, H = hidden_states.shape
    x2d = hidden_states.reshape(B * S, H)                    # free reshape

    q2d, k2d, v2d = qkv_projection(
        x2d, fused_params["w_qkv"], fused_params["b_qkv"],
        use_bf16=use_bf16, row_tile=row_tile)

    # Free reshapes to [B, S, H]; head split/merge happens inside the
    # attention BlockSpec index_maps (no plain-JAX transposes).
    q3 = q2d.reshape(B, S, H)
    k3 = k2d.reshape(B, S, H)
    v3 = v2d.reshape(B, S, H)

    return multi_head_attention(q3, k3, v3, attention_mask,
                                num_heads=num_heads, use_bf16=use_bf16)


# ----------------------------------------------------------------------------
# Pure-JAX reference (mirrors the PyTorch forward semantics, f32 everywhere)
# ----------------------------------------------------------------------------
def reference_forward(hidden_states, attention_mask, params, num_heads):
    B, S, H = hidden_states.shape
    d = H // num_heads
    hi = jax.lax.Precision.HIGHEST

    q = jnp.einsum("bsh,ho->bso", hidden_states, params["wq"], precision=hi) \
        + params["bq"][0]
    k = jnp.einsum("bsh,ho->bso", hidden_states, params["wk"], precision=hi) \
        + params["bk"][0]
    v = jnp.einsum("bsh,ho->bso", hidden_states, params["wv"], precision=hi) \
        + params["bv"][0]

    def split(t):
        return t.reshape(B, S, num_heads, d).transpose(0, 2, 1, 3)

    q, k, v = split(q), split(k), split(v)
    scores = jnp.einsum("bhqd,bhkd->bhqk", q, k, precision=hi) / math.sqrt(d)
    scores = scores + attention_mask
    probs = jax.nn.softmax(scores, axis=-1)
    ctx = jnp.einsum("bhqk,bhkd->bhqd", probs, v, precision=hi)
    return ctx.transpose(0, 2, 1, 3).reshape(B, S, H)


# ----------------------------------------------------------------------------
# Test harness
# ----------------------------------------------------------------------------
def _run_case(key, B, S, H, NH, *, use_bf16, rtol, atol, row_tile=512):
    keys = jax.random.split(key, 7)
    hidden_states = jax.random.normal(keys[0], (B, S, H), dtype=jnp.float32)

    init = lambda k, shape: jax.random.normal(k, shape, jnp.float32) * 0.02
    params = {
        "wq": init(keys[1], (H, H)), "bq": init(keys[2], (1, H)),
        "wk": init(keys[3], (H, H)), "bk": init(keys[4], (1, H)),
        "wv": init(keys[5], (H, H)), "bv": init(keys[6], (1, H)),
    }

    # Standard BERT additive attention mask [B, 1, 1, S]: 0 keep, -1e4 masked.
    pad = jnp.zeros((B, S), dtype=jnp.float32)
    pad = pad.at[1, S - 2:].set(-10000.0)   # mask last two keys of batch 1
    attention_mask = pad[:, None, None, :]

    fused = prepare_attention_params(params, NH, use_bf16=use_bf16)
    out = bert_self_attention_forward(hidden_states, attention_mask, fused,
                                      NH, use_bf16=use_bf16, row_tile=row_tile)
    out = jax.block_until_ready(out)

    ref = reference_forward(hidden_states, attention_mask, params, NH)
    np.testing.assert_allclose(np.asarray(out), np.asarray(ref),
                               rtol=rtol, atol=atol)


if __name__ == "__main__":
    key = jax.random.PRNGKey(0)
    k1, k2, k3 = jax.random.split(key, 3)

    # Small config consistent with the module: B=2, S=8, hidden=32, 4 heads.
    _run_case(k1, 2, 8, 32, 4, use_bf16=False, rtol=2e-3, atol=2e-3)

    # Larger config exercising the 128-lane head-group path, a multi-step row
    # grid and a PARTIAL last row tile (N=256, tn=96 -> tiles 96/96/64).
    _run_case(k2, 2, 128, 256, 4, use_bf16=False, rtol=2e-3, atol=2e-3,
              row_tile=96)

    # bf16 MXU fast path (f32 accumulation, bf16 Q/K/V intermediates, bf16
    # resident weight) -- beneficial on v5e/v6e/v7x alike; loose tolerance.
    _run_case(k3, 2, 128, 256, 4, use_bf16=True, rtol=5e-2, atol=5e-2)

    print("KERNEL_OK")
</pallas_src>

<mosaic_0001>
module attributes {stable_mosaic.version = 11 : i64} {
  func.func @qkv_proj_kernel(%arg0: i32, %arg1: memref<16x32xf32, #tpu.memory_space<vmem>>, %arg2: memref<32x96xf32, #tpu.memory_space<vmem>>, %arg3: memref<1x96xf32, #tpu.memory_space<vmem>>, %arg4: memref<16x32xf32, #tpu.memory_space<vmem>>, %arg5: memref<16x32xf32, #tpu.memory_space<vmem>>, %arg6: memref<16x32xf32, #tpu.memory_space<vmem>>) attributes {dimension_semantics = [#tpu.dimension_semantics<parallel>], iteration_bounds = array<i64: 1>, scalar_prefetch = 0 : i64, scratch_operands = 0 : i64, tpu.core_type = #tpu.core_type<tc>, window_params = [{transform_indices = @transform_0, window_bounds = array<i64: 16, 32>}, {pipeline_mode = #tpu.pipeline_mode<synchronous>, transform_indices = @transform_1, window_bounds = array<i64: 32, 96>}, {pipeline_mode = #tpu.pipeline_mode<synchronous>, transform_indices = @transform_2, window_bounds = array<i64: 1, 96>}, {transform_indices = @transform_3, window_bounds = array<i64: 16, 32>}, {transform_indices = @transform_4, window_bounds = array<i64: 16, 32>}, {transform_indices = @transform_5, window_bounds = array<i64: 16, 32>}]} {
    %c0 = arith.constant 0 : index
    %c0_0 = arith.constant 0 : index
    %0 = vector.load %arg1[%c0, %c0_0] : memref<16x32xf32, #tpu.memory_space<vmem>>, vector<16x32xf32>
    %c0_1 = arith.constant 0 : index
    %c0_2 = arith.constant 0 : index
    %1 = vector.load %arg2[%c0_1, %c0_2] : memref<32x96xf32, #tpu.memory_space<vmem>>, vector<32x96xf32>
    %cst = arith.constant dense<0.000000e+00> : vector<16x96xf32>
    %2 = tpu.matmul %0, %1, %cst {dimension_numbers = #tpu.dot_dimension_numbers<[1], [0], [0], [1], [0, 0, 1, 1], [], []>} : vector<16x32xf32>, vector<32x96xf32>, vector<16x96xf32> -> vector<16x96xf32>
    %c0_3 = arith.constant 0 : index
    %c0_4 = arith.constant 0 : index
    %3 = vector.load %arg3[%c0_3, %c0_4] : memref<1x96xf32, #tpu.memory_space<vmem>>, vector<1x96xf32>
    %4 = vector.broadcast %3 : vector<1x96xf32> to vector<16x96xf32>
    %5 = arith.addf %2, %4 : vector<16x96xf32>
    %6 = vector.extract_strided_slice %5 {offsets = [0, 0], sizes = [16, 32], strides = [1, 1]} : vector<16x96xf32> to vector<16x32xf32>
    %c0_5 = arith.constant 0 : index
    %c0_6 = arith.constant 0 : index
    %7 = vector.load %arg4[%c0_5, %c0_6] : memref<16x32xf32, #tpu.memory_space<vmem>>, vector<16x32xf32>
    tpu.vector_store %arg4[%c0_5, %c0_6], %6 {strides = array<i32>} : memref<16x32xf32, #tpu.memory_space<vmem>>, vector<16x32xf32>,
    %8 = vector.extract_strided_slice %5 {offsets = [0, 32], sizes = [16, 32], strides = [1, 1]} : vector<16x96xf32> to vector<16x32xf32>
    %c0_7 = arith.constant 0 : index
    %c0_8 = arith.constant 0 : index
    %9 = vector.load %arg5[%c0_7, %c0_8] : memref<16x32xf32, #tpu.memory_space<vmem>>, vector<16x32xf32>
    tpu.vector_store %arg5[%c0_7, %c0_8], %8 {strides = array<i32>} : memref<16x32xf32, #tpu.memory_space<vmem>>, vector<16x32xf32>,
    %10 = vector.extract_strided_slice %5 {offsets = [0, 64], sizes = [16, 32], strides = [1, 1]} : vector<16x96xf32> to vector<16x32xf32>
    %c0_9 = arith.constant 0 : index
    %c0_10 = arith.constant 0 : index
    %11 = vector.load %arg6[%c0_9, %c0_10] : memref<16x32xf32, #tpu.memory_space<vmem>>, vector<16x32xf32>
    tpu.vector_store %arg6[%c0_9, %c0_10], %10 {strides = array<i32>} : memref<16x32xf32, #tpu.memory_space<vmem>>, vector<16x32xf32>,
    return
  }
  func.func @transform_0(%arg0: i32) -> (i32, i32) {
    %c0_i32 = arith.constant 0 : i32
    %c0_i32_0 = arith.constant 0 : i32
    return %arg0, %c0_i32 : i32, i32
  }
  func.func @transform_1(%arg0: i32) -> (i32, i32) {
    %c0_i32 = arith.constant 0 : i32
    %c0_i32_0 = arith.constant 0 : i32
    %c0_i32_1 = arith.constant 0 : i32
    return %c0_i32, %c0_i32_0 : i32, i32
  }
  func.func @transform_2(%arg0: i32) -> (i32, i32) {
    %c0_i32 = arith.constant 0 : i32
    %c0_i32_0 = arith.constant 0 : i32
    %c0_i32_1 = arith.constant 0 : i32
    return %c0_i32, %c0_i32_0 : i32, i32
  }
  func.func @transform_3(%arg0: i32) -> (i32, i32) {
    %c0_i32 = arith.constant 0 : i32
    %c0_i32_0 = arith.constant 0 : i32
    return %arg0, %c0_i32 : i32, i32
  }
  func.func @transform_4(%arg0: i32) -> (i32, i32) {
    %c0_i32 = arith.constant 0 : i32
    %c0_i32_0 = arith.constant 0 : i32
    return %arg0, %c0_i32 : i32, i32
  }
  func.func @transform_5(%arg0: i32) -> (i32, i32) {
    %c0_i32 = arith.constant 0 : i32
    %c0_i32_0 = arith.constant 0 : i32
    return %arg0, %c0_i32 : i32, i32
  }
}

module attributes {stable_mosaic.version = 11 : i64} {
  func.func @qkv_proj_kernel(%arg0: i32, %arg1: memref<16x32xf32, #tpu.memory_space<vmem>>, %arg2: memref<32x96xf32, #tpu.memory_space<vmem>>, %arg3: memref<1x96xf32, #tpu.memory_space<vmem>>, %arg4: memref<16x32xf32, #tpu.memory_space<vmem>>, %arg5: memref<16x32xf32, #tpu.memory_space<vmem>>, %arg6: memref<16x32xf32, #tpu.memory_space<vmem>>) attributes {dimension_semantics = [#tpu.dimension_semantics<parallel>], iteration_bounds = array<i64: 1>, scalar_prefetch = 0 : i64, scratch_operands = 0 : i64, tpu.core_type = #tpu.core_type<tc>, window_params = [{transform_indices = @transform_0, window_bounds = array<i64: 16, 32>}, {pipeline_mode = #tpu.pipeline_mode<synchronous>, transform_indices = @transform_1, window_bounds = array<i64: 32, 96>}, {pipeline_mode = #tpu.pipeline_mode<synchronous>, transform_indices = @transform_2, window_bounds = array<i64: 1, 96>}, {transform_indices = @transform_3, window_bounds = array<i64: 16, 32>}, {transform_indices = @transform_4, window_bounds = array<i64: 16, 32>}, {transform_indices = @transform_5, window_bounds = array<i64: 16, 32>}]} {
    %c0 = arith.constant 0 : index
    %c0_0 = arith.constant 0 : index
    %0 = vector.load %arg1[%c0, %c0_0] : memref<16x32xf32, #tpu.memory_space<vmem>>, vector<16x32xf32>
    %c0_1 = arith.constant 0 : index
    %c0_2 = arith.constant 0 : index
    %1 = vector.load %arg2[%c0_1, %c0_2] : memref<32x96xf32, #tpu.memory_space<vmem>>, vector<32x96xf32>
    %cst = arith.constant dense<0.000000e+00> : vector<16x96xf32>
    %2 = tpu.matmul %0, %1, %cst {dimension_numbers = #tpu.dot_dimension_numbers<[1], [0], [0], [1], [0, 0, 1, 1], [], []>} : vector<16x32xf32>, vector<32x96xf32>, vector<16x96xf32> -> vector<16x96xf32>
    %c0_3 = arith.constant 0 : index
    %c0_4 = arith.constant 0 : index
    %3 = vector.load %arg3[%c0_3, %c0_4] : memref<1x96xf32, #tpu.memory_space<vmem>>, vector<1x96xf32>
    %4 = vector.broadcast %3 : vector<1x96xf32> to vector<16x96xf32>
    %5 = arith.addf %2, %4 : vector<16x96xf32>
    %6 = vector.extract_strided_slice %5 {offsets = [0, 0], sizes = [16, 32], strides = [1, 1]} : vector<16x96xf32> to vector<16x32xf32>
    %c0_5 = arith.constant 0 : index
    %c0_6 = arith.constant 0 : index
    %7 = vector.load %arg4[%c0_5, %c0_6] : memref<16x32xf32, #tpu.memory_space<vmem>>, vector<16x32xf32>
    tpu.vector_store %arg4[%c0_5, %c0_6], %6 {strides = array<i32>} : memref<16x32xf32, #tpu.memory_space<vmem>>, vector<16x32xf32>,
    %8 = vector.extract_strided_slice %5 {offsets = [0, 32], sizes = [16, 32], strides = [1, 1]} : vector<16x96xf32> to vector<16x32xf32>
    %c0_7 = arith.constant 0 : index
    %c0_8 = arith.constant 0 : index
    %9 = vector.load %arg5[%c0_7, %c0_8] : memref<16x32xf32, #tpu.memory_space<vmem>>, vector<16x32xf32>
    tpu.vector_store %arg5[%c0_7, %c0_8], %8 {strides = array<i32>} : memref<16x32xf32, #tpu.memory_space<vmem>>, vector<16x32xf32>,
    %10 = vector.extract_strided_slice %5 {offsets = [0, 64], sizes = [16, 32], strides = [1, 1]} : vector<16x96xf32> to vector<16x32xf32>
    %c0_9 = arith.constant 0 : index
    %c0_10 = arith.constant 0 : index
    %11 = vector.load %arg6[%c0_9, %c0_10] : memref<16x32xf32, #tpu.memory_space<vmem>>, vector<16x32xf32>
    tpu.vector_store %arg6[%c0_9, %c0_10], %10 {strides = array<i32>} : memref<16x32xf32, #tpu.memory_space<vmem>>, vector<16x32xf32>,
    return
  }
  func.func @transform_0(%arg0: i32) -> (i32, i32) {
    %c0_i32 = arith.constant 0 : i32
    %c0_i32_0 = arith.constant 0 : i32
    return %arg0, %c0_i32 : i32, i32
  }
  func.func @transform_1(%arg0: i32) -> (i32, i32) {
    %c0_i32 = arith.constant 0 : i32
    %c0_i32_0 = arith.constant 0 : i32
    %c0_i32_1 = arith.constant 0 : i32
    return %c0_i32, %c0_i32_0 : i32, i32
  }
  func.func @transform_2(%arg0: i32) -> (i32, i32) {
    %c0_i32 = arith.constant 0 : i32
    %c0_i32_0 = arith.constant 0 : i32
    %c0_i32_1 = arith.constant 0 : i32
    return %c0_i32, %c0_i32_0 : i32, i32
  }
  func.func @transform_3(%arg0: i32) -> (i32, i32) {
    %c0_i32 = arith.constant 0 : i32
    %c0_i32_0 = arith.constant 0 : i32
    return %arg0, %c0_i32 : i32, i32
  }
  func.func @transform_4(%arg0: i32) -> (i32, i32) {
    %c0_i32 = arith.constant 0 : i32
    %c0_i32_0 = arith.constant 0 : i32
    return %arg0, %c0_i32 : i32, i32
  }
  func.func @transform_5(%arg0: i32) -> (i32, i32) {
    %c0_i32 = arith.constant 0 : i32
    %c0_i32_0 = arith.constant 0 : i32
    return %arg0, %c0_i32 : i32, i32
  }
}

</mosaic_0001>

<bundles_post_ra>
// kernel: tpu_custom_call.1
= control target key start
LH: loop header
LB: loop body
LE: loop exit
PB: predicated region body
PF: predicated region fallthrough
CT: control target
= control target key end

     0   :  { %11 = vsyncpa [#allocation3], 0  ;;  %s549_s0 = inlined_call_operand.hbm [shape: f32[16,32], index: 0, kind: input, shape index: {}]   ;;  %s550_s1 = inlined_call_operand.hbm [shape: f32[32,96], index: 1, kind: input, shape index: {}]   ;;  %s551_s2 = inlined_call_operand.hbm [shape: f32[1,96], index: 2, kind: input, shape index: {}]   ;;  %s552_s3 = inlined_call_operand.hbm [shape: f32[16,32], index: 3, kind: output, shape index: {0}]   ;;  %s553_s4 = inlined_call_operand.hbm [shape: f32[16,32], index: 4, kind: output, shape index: {1}]   ;;  %s554_s5 = inlined_call_operand.hbm [shape: f32[16,32], index: 5, kind: output, shape index: {2}]  }
   0x1   :  { %12 = vsyncpa [#allocation6], 0 }
   0x2   :  { %13 = vsyncpa [#allocation4], 0 }
   0x3   :  { %14 = vsyncpa [#allocation10], 0  ;;  %s400_s18 = smov [#allocation5]   ;;  %s401_s20 = smov [#allocation2]  }
   0x4   :  { %s32_s19 = sshll.u32 %s400_s18, 4  ;;  %s20_s21 = sshll.u32 %s401_s20, 4  ;;  %s33_s19 = int_to_ptr.vmem [resolvable:$true] %s32_s19  ;;  %s440_s21 = int_to_ptr.vmem [resolvable:$true] %s20_s21 }
   0x5   :  { %s260_s24 = scalar_lea.hbm %s550_s1, 512 }
   0x6   :  { %p261_p0 = scmp.ne.s32.totalorder %s550_s1, %s260_s24  ;;  %p264_p1 = scmp.lt.u32.totalorder %s260_s24, %s550_s1 }
   0x8   :  { %p266_p2 = pnand %p264_p1, %p261_p0 }
   0xa   :  { %269 = shalt.err (!%p266_p2)
}
   0xb   :  { %s270_s29 = scalar_lea.vmem %s33_s19, 512  ;;  %p275_p4 = scmp.lt.s32.totalorder %s33_s19, %s33_s19 }
   0xc   :  { %p271_p3 = scmp.ne.s32.totalorder %s33_s19, %s270_s29  ;;  %p276_p5 = scmp.lt.s32.totalorder %s270_s29, %s270_s29 }
   0xe   :  { %p277_p6 = por %p276_p5, %p275_p4 }
  0x10   :  { %p278_p7 = pnand %p277_p6, %p271_p3 }
  0x12   :  { %281 = shalt.err (!%p278_p7)
}
  0x13   :  { %s402_s30 = smov 128   ;;  %s403_s6 = smov 8  }
  0x14   :  { %38 = dma.hbm_to_vmem [thread:$0]  %s550_s1, 512, %s33_s19, [#allocation6], %s402_s30, %s402_s30, %s403_s6  }
  0x15   :  { %s282_s11 = scalar_lea.hbm %s549_s0, 256 }
  0x16   :  { %p283_p8 = scmp.ne.s32.totalorder %s549_s0, %s282_s11  ;;  %p286_p9 = scmp.lt.u32.totalorder %s282_s11, %s549_s0 }
  0x18   :  { %p288_p10 = pnand %p286_p9, %p283_p8 }
  0x1a   :  { %291 = shalt.err (!%p288_p10)
}
  0x1b   :  { %s292_s16 = scalar_lea.vmem %s440_s21, 256  ;;  %p297_p12 = scmp.lt.s32.totalorder %s440_s21, %s440_s21 }
  0x1c   :  { %p293_p11 = scmp.ne.s32.totalorder %s440_s21, %s292_s16  ;;  %p298_p13 = scmp.lt.s32.totalorder %s292_s16, %s292_s16 }
  0x1e   :  { %p299_p0 = por %p298_p13, %p297_p12 }
  0x20   :  { %p300_p1 = pnand %p299_p0, %p293_p11 }
  0x22   :  { %303 = shalt.err (!%p300_p1)
}
  0x23   :  { %26 = dma.hbm_to_vmem [thread:$0]  %s549_s0, 256, %s440_s21, [#allocation3], %s402_s30, %s402_s30, %s403_s6  }
  0x24   :  { %s404_s18 = smov [#allocation7]   ;;  %s304_s23 = scalar_lea.hbm %s551_s2, 16 }
  0x25   :  { %s45_s19 = sshll.u32 %s404_s18, 4  ;;  %p305_p2 = scmp.ne.s32.totalorder %s551_s2, %s304_s23  ;;  %s46_s19 = int_to_ptr.vmem [resolvable:$true] %s45_s19 }
  0x26   :  { %p308_p3 = scmp.lt.u32.totalorder %s304_s23, %s551_s2 }
  0x28   :  { %p310_p4 = pnand %p308_p3, %p305_p2 }
  0x2a   :  { %313 = shalt.err (!%p310_p4)
}
  0x2b   :  { %s314_s28 = scalar_lea.vmem %s46_s19, 16  ;;  %s318_s0 = scalar_lea.vmem %s46_s19, 32 }
  0x2c   :  { %p315_p5 = scmp.ne.s32.totalorder %s46_s19, %s314_s28  ;;  %p319_p6 = scmp.lt.s32.totalorder %s46_s19, %s46_s19 }
  0x2d   :  { %p320_p7 = scmp.lt.s32.totalorder %s318_s0, %s314_s28 }
  0x2f   :  { %p321_p8 = por %p320_p7, %p319_p6 }
  0x31   :  { %p322_p9 = pnand %p321_p8, %p315_p5 }
  0x33   :  { %325 = shalt.err (!%p322_p9)
}
  0x34   :  { %48 = dma.hbm_to_vmem [thread:$0]  %s551_s2, 16, %s46_s19, [#allocation6]  }
  0x35   :  { %392 = dma.done.wait [#allocation3], 256  }
  0x36   :  { %393 = vsyncadd [#allocation3], 4294967040 }
  0x37   :  { %394 = dma.done.wait [#allocation6], 528  }
  0x38   :  { %395 = vsyncadd [#allocation6], 4294966768  ;;  %vm71_vm0 = vcmask 261120   ;;  %v60_v0 = vld [vmem:[#allocation5] sm:$0xff]  ;;  %v61_v1 = vld [vmem:[#allocation5 + $0x8] sm:$0xff]  ;;  %s405_s2 = smov [#allocation8]  }
  0x39   :  { %v62_v2 = vld [vmem:[#allocation5 + $0x10] sm:$0xff]  ;;  %v242_v3 = vpack.c.bf16 %v61_v1, %v60_v0  ;;  %v63_v4 = vld [vmem:[#allocation5 + $0x18] sm:$0xff]  ;;  %v222_v8 = vld [vmem:[#allocation7] ss:$0 sm:$0xff]  ;;  %s178_s7 = sshll.u32 %s405_s2, 4  ;;  %s406_s8 = smov 64   ;;  %s179_s7 = int_to_ptr.vmem [resolvable:$true] %s178_s7 }
  0x3a   :  { %v58_v5 = vld [vmem:[#allocation2] sm:$0xff]  ;;  %v246_v6 = vpack.c.bf16 %v63_v4, %v62_v2  ;;  %v59_v7 = vld [vmem:[#allocation2 + $0x8] sm:$0xff]  ;;  %s407_s9 = smov 96   ;;  %s326_s10 = scalar_lea.vmem %s179_s7, 256 }
  0x3b   :  { %239 = vmatprep.mubr.msk.f32.mxu0 %vm71_vm0, %v58_v5  ;;  %243 = vmatprep.subr.bf16.mxu0 %v242_v3  ;;  %p327_p10 = scmp.ne.s32.totalorder %s179_s7, %s326_s10  ;;  %p331_p11 = scmp.lt.s32.totalorder %s179_s7, %s179_s7 }
  0x3c   :  { %245 = vmatpush3.bf16.msra.mxu0 %v242_v3  ;;  %p332_p12 = scmp.lt.s32.totalorder %s326_s10, %s326_s10 }
  0x3d   :  { %247 = vmatprep.subr.bf16.mxu0 %v246_v6 }
  0x3e   :  { %p333_p13 = por %p332_p12, %p331_p11 }
  0x40   :  { %249 = vmatpush3.bf16.msra.mxu0 %v246_v6  ;;  %p334_p0 = pnand %p333_p13, %p327_p10 }
  0x43   :  { %240 = vmatmul.mubr.msk.f32.vlgmr.msra.gmra.mrb[0].mxu0 %vm71_vm0, %v59_v7 }
 0x116   :  { %v241_v9 = vpop.f32.mrb[0].mxu0 }
 0x117   :  { %v150_v10 = vadd.f32 %v241_v9, %v222_v8  ;;  %v144_v11 = vpop.f32.mrb[1].mxu0 }
 0x118   :  { %v145_v12 = vadd.f32 %v222_v8, %v144_v11 }
 0x119   :  { %154 = vst.msk [vmem:[#allocation8 + $0x8] sm:$0xff] %vm71_vm0, %v150_v10 }
 0x11a   :  { %153 = vst.msk [vmem:[#allocation8] sm:$0xff] %vm71_vm0, %v145_v12  ;;  %165 = vrot.lane.b32.xlu1 %v145_v12, %s406_s8  ;;  %157 = vrot.lane.b32.xlu0 %v145_v12, %s407_s9 }
 0x11b   :  { %337 = shalt.err (!%p334_p0)
}
 0x11c   :  { %s338_s13 = scalar_lea.hbm %s552_s3, 256 }
 0x11d   :  { %p339_p1 = scmp.ne.s32.totalorder %s552_s3, %s338_s13  ;;  %p342_p2 = scmp.lt.u32.totalorder %s338_s13, %s552_s3 }
 0x11f   :  { %p344_p3 = pnand %p342_p2, %p339_p1 }
 0x121   :  { %347 = shalt.err (!%p344_p3)
}
 0x122   :  { %184 = dma.vmem_to_hbm [thread:$0]  %s179_s7, 256, %s552_s3, [#allocation4], %s402_s30, %s402_s30, %s403_s6  }
 0x123   :  { %167 = vrot.lane.b32.xlu1 %v150_v10, %s406_s8  ;;  %159 = vrot.lane.b32.xlu0 %v150_v10, %s407_s9  ;;  %s408_s19 = smov [#allocation9]   ;;  %s409_s22 = smov [#allocation11]  }
 0x124   :  { %s190_s20 = sshll.u32 %s408_s19, 4  ;;  %s202_s23 = sshll.u32 %s409_s22, 4  ;;  %s191_s20 = int_to_ptr.vmem [resolvable:$true] %s190_s20  ;;  %s510_s23 = int_to_ptr.vmem [resolvable:$true] %s202_s23 }
 0x125   :  { %s348_s3 = scalar_lea.vmem %s191_s20, 256  ;;  %p353_p5 = scmp.lt.s32.totalorder %s191_s20, %s191_s20 }
 0x126   :  { %p349_p4 = scmp.ne.s32.totalorder %s191_s20, %s348_s3  ;;  %p354_p6 = scmp.lt.s32.totalorder %s348_s3, %s348_s3 }
 0x128   :  { %p355_p7 = por %p354_p6, %p353_p5 }
 0x12a   :  { %p356_p8 = pnand %p355_p7, %p349_p4 }
 0x18c   :  { %v166_v13 = vpop.permute.xlu1 %165  ;;  %v158_v14 = vpop.permute.xlu0 %157 }
 0x18d   :  { %171 = vst.msk [vmem:[#allocation11] sm:$0xff] %vm71_vm0, %v166_v13  ;;  %163 = vst.msk [vmem:[#allocation9] sm:$0xff] %vm71_vm0, %v158_v14 }
 0x195   :  { %v168_v15 = vpop.permute.xlu1 %167  ;;  %v160_v16 = vpop.permute.xlu0 %159 }
 0x196   :  { %172 = vst.msk [vmem:[#allocation11 + $0x8] sm:$0xff] %vm71_vm0, %v168_v15  ;;  %164 = vst.msk [vmem:[#allocation9 + $0x8] sm:$0xff] %vm71_vm0, %v160_v16 }
 0x197   :  { %359 = shalt.err (!%p356_p8)
}
 0x198   :  { %s360_s26 = scalar_lea.hbm %s553_s4, 256 }
 0x199   :  { %p361_p9 = scmp.ne.s32.totalorder %s553_s4, %s360_s26  ;;  %p364_p10 = scmp.lt.u32.totalorder %s360_s26, %s553_s4 }
 0x19b   :  { %p366_p11 = pnand %p364_p10, %p361_p9 }
 0x19d   :  { %369 = shalt.err (!%p366_p11)
}
 0x19e   :  { %196 = dma.vmem_to_hbm [thread:$0]  %s191_s20, 256, %s553_s4, [#allocation10], %s402_s30, %s402_s30, %s403_s6  }
 0x19f   :  { %s370_s7 = scalar_lea.vmem %s510_s23, 256  ;;  %p375_p13 = scmp.lt.s32.totalorder %s510_s23, %s510_s23 }
 0x1a0   :  { %p371_p12 = scmp.ne.s32.totalorder %s510_s23, %s370_s7  ;;  %p376_p0 = scmp.lt.s32.totalorder %s370_s7, %s370_s7 }
 0x1a2   :  { %p377_p1 = por %p376_p0, %p375_p13 }
 0x1a4   :  { %p378_p2 = pnand %p377_p1, %p371_p12 }
 0x1a6   :  { %381 = shalt.err (!%p378_p2)
}
 0x1a7   :  { %s382_s10 = scalar_lea.hbm %s554_s5, 256 }
 0x1a8   :  { %p383_p3 = scmp.ne.s32.totalorder %s554_s5, %s382_s10  ;;  %p386_p4 = scmp.lt.u32.totalorder %s382_s10, %s554_s5 }
 0x1aa   :  { %p388_p5 = pnand %p386_p4, %p383_p3 }
 0x1ac   :  { %391 = shalt.err (!%p388_p5)
}
 0x1ad   :  { %208 = dma.vmem_to_hbm [thread:$0]  %s510_s23, 256, %s554_s5, [#allocation10], %s402_s30, %s402_s30, %s403_s6  }
 0x1ae   :  { %396 = dma.done.wait [#allocation4], 256  }
 0x1af   :  { %397 = vsyncadd [#allocation4], 4294967040 }
 0x1b0   :  { %398 = dma.done.wait [#allocation10], 512  }
 0x1b1   :  { %399 = vsyncadd [#allocation10], 4294966784 }
 0x1b2   :  { %218 = vsyncpa [#allocation3], 1 }
 0x1b3   :  { %219 = vsyncpa [#allocation6], 1 }
 0x1b4   :  { %220 = vsyncpa [#allocation4], 1 }
 0x1b5   :  { %221 = vsyncpa [#allocation10], 1 }

// kernel: tpu_custom_call.1
= control target key start
LH: loop header
LB: loop body
LE: loop exit
PB: predicated region body
PF: predicated region fallthrough
CT: control target
= control target key end

     0   :  { %11 = vsyncpa [#allocation3], 0  ;;  %s549_s0 = inlined_call_operand.hbm [shape: f32[16,32], index: 0, kind: input, shape index: {}]   ;;  %s550_s1 = inlined_call_operand.hbm [shape: f32[32,96], index: 1, kind: input, shape index: {}]   ;;  %s551_s2 = inlined_call_operand.hbm [shape: f32[1,96], index: 2, kind: input, shape index: {}]   ;;  %s552_s3 = inlined_call_operand.hbm [shape: f32[16,32], index: 3, kind: output, shape index: {0}]   ;;  %s553_s4 = inlined_call_operand.hbm [shape: f32[16,32], index: 4, kind: output, shape index: {1}]   ;;  %s554_s5 = inlined_call_operand.hbm [shape: f32[16,32], index: 5, kind: output, shape index: {2}]  }
   0x1   :  { %12 = vsyncpa [#allocation6], 0 }
   0x2   :  { %13 = vsyncpa [#allocation4], 0 }
   0x3   :  { %14 = vsyncpa [#allocation10], 0  ;;  %s400_s18 = smov [#allocation5]   ;;  %s401_s20 = smov [#allocation2]  }
   0x4   :  { %s32_s19 = sshll.u32 %s400_s18, 4  ;;  %s20_s21 = sshll.u32 %s401_s20, 4  ;;  %s33_s19 = int_to_ptr.vmem [resolvable:$true] %s32_s19  ;;  %s440_s21 = int_to_ptr.vmem [resolvable:$true] %s20_s21 }
   0x5   :  { %s260_s24 = scalar_lea.hbm %s550_s1, 512 }
   0x6   :  { %p261_p0 = scmp.ne.s32.totalorder %s550_s1, %s260_s24  ;;  %p264_p1 = scmp.lt.u32.totalorder %s260_s24, %s550_s1 }
   0x8   :  { %p266_p2 = pnand %p264_p1, %p261_p0 }
   0xa   :  { %269 = shalt.err (!%p266_p2)
}
   0xb   :  { %s270_s29 = scalar_lea.vmem %s33_s19, 512  ;;  %p275_p4 = scmp.lt.s32.totalorder %s33_s19, %s33_s19 }
   0xc   :  { %p271_p3 = scmp.ne.s32.totalorder %s33_s19, %s270_s29  ;;  %p276_p5 = scmp.lt.s32.totalorder %s270_s29, %s270_s29 }
   0xe   :  { %p277_p6 = por %p276_p5, %p275_p4 }
  0x10   :  { %p278_p7 = pnand %p277_p6, %p271_p3 }
  0x12   :  { %281 = shalt.err (!%p278_p7)
}
  0x13   :  { %s402_s30 = smov 128   ;;  %s403_s6 = smov 8  }
  0x14   :  { %38 = dma.hbm_to_vmem [thread:$0]  %s550_s1, 512, %s33_s19, [#allocation6], %s402_s30, %s402_s30, %s403_s6  }
  0x15   :  { %s282_s11 = scalar_lea.hbm %s549_s0, 256 }
  0x16   :  { %p283_p8 = scmp.ne.s32.totalorder %s549_s0, %s282_s11  ;;  %p286_p9 = scmp.lt.u32.totalorder %s282_s11, %s549_s0 }
  0x18   :  { %p288_p10 = pnand %p286_p9, %p283_p8 }
  0x1a   :  { %291 = shalt.err (!%p288_p10)
}
  0x1b   :  { %s292_s16 = scalar_lea.vmem %s440_s21, 256  ;;  %p297_p12 = scmp.lt.s32.totalorder %s440_s21, %s440_s21 }
  0x1c   :  { %p293_p11 = scmp.ne.s32.totalorder %s440_s21, %s292_s16  ;;  %p298_p13 = scmp.lt.s32.totalorder %s292_s16, %s292_s16 }
  0x1e   :  { %p299_p0 = por %p298_p13, %p297_p12 }
  0x20   :  { %p300_p1 = pnand %p299_p0, %p293_p11 }
  0x22   :  { %303 = shalt.err (!%p300_p1)
}
  0x23   :  { %26 = dma.hbm_to_vmem [thread:$0]  %s549_s0, 256, %s440_s21, [#allocation3], %s402_s30, %s402_s30, %s403_s6  }
  0x24   :  { %s404_s18 = smov [#allocation7]   ;;  %s304_s23 = scalar_lea.hbm %s551_s2, 16 }
  0x25   :  { %s45_s19 = sshll.u32 %s404_s18, 4  ;;  %p305_p2 = scmp.ne.s32.totalorder %s551_s2, %s304_s23  ;;  %s46_s19 = int_to_ptr.vmem [resolvable:$true] %s45_s19 }
  0x26   :  { %p308_p3 = scmp.lt.u32.totalorder %s304_s23, %s551_s2 }
  0x28   :  { %p310_p4 = pnand %p308_p3, %p305_p2 }
  0x2a   :  { %313 = shalt.err (!%p310_p4)
}
  0x2b   :  { %s314_s28 = scalar_lea.vmem %s46_s19, 16  ;;  %s318_s0 = scalar_lea.vmem %s46_s19, 32 }
  0x2c   :  { %p315_p5 = scmp.ne.s32.totalorder %s46_s19, %s314_s28  ;;  %p319_p6 = scmp.lt.s32.totalorder %s46_s19, %s46_s19 }
  0x2d   :  { %p320_p7 = scmp.lt.s32.totalorder %s318_s0, %s314_s28 }
  0x2f   :  { %p321_p8 = por %p320_p7, %p319_p6 }
  0x31   :  { %p322_p9 = pnand %p321_p8, %p315_p5 }
  0x33   :  { %325 = shalt.err (!%p322_p9)
}
  0x34   :  { %48 = dma.hbm_to_vmem [thread:$0]  %s551_s2, 16, %s46_s19, [#allocation6]  }
  0x35   :  { %392 = dma.done.wait [#allocation3], 256  }
  0x36   :  { %393 = vsyncadd [#allocation3], 4294967040 }
  0x37   :  { %394 = dma.done.wait [#allocation6], 528  }
  0x38   :  { %395 = vsyncadd [#allocation6], 4294966768  ;;  %vm71_vm0 = vcmask 261120   ;;  %v60_v0 = vld [vmem:[#allocation5] sm:$0xff]  ;;  %v61_v1 = vld [vmem:[#allocation5 + $0x8] sm:$0xff]  ;;  %s405_s2 = smov [#allocation8]  }
  0x39   :  { %v62_v2 = vld [vmem:[#allocation5 + $0x10] sm:$0xff]  ;;  %v242_v3 = vpack.c.bf16 %v61_v1, %v60_v0  ;;  %v63_v4 = vld [vmem:[#allocation5 + $0x18] sm:$0xff]  ;;  %v222_v8 = vld [vmem:[#allocation7] ss:$0 sm:$0xff]  ;;  %s178_s7 = sshll.u32 %s405_s2, 4  ;;  %s406_s8 = smov 64   ;;  %s179_s7 = int_to_ptr.vmem [resolvable:$true] %s178_s7 }
  0x3a   :  { %v58_v5 = vld [vmem:[#allocation2] sm:$0xff]  ;;  %v246_v6 = vpack.c.bf16 %v63_v4, %v62_v2  ;;  %v59_v7 = vld [vmem:[#allocation2 + $0x8] sm:$0xff]  ;;  %s407_s9 = smov 96   ;;  %s326_s10 = scalar_lea.vmem %s179_s7, 256 }
  0x3b   :  { %239 = vmatprep.mubr.msk.f32.mxu0 %vm71_vm0, %v58_v5  ;;  %243 = vmatprep.subr.bf16.mxu0 %v242_v3  ;;  %p327_p10 = scmp.ne.s32.totalorder %s179_s7, %s326_s10  ;;  %p331_p11 = scmp.lt.s32.totalorder %s179_s7, %s179_s7 }
  0x3c   :  { %245 = vmatpush3.bf16.msra.mxu0 %v242_v3  ;;  %p332_p12 = scmp.lt.s32.totalorder %s326_s10, %s326_s10 }
  0x3d   :  { %247 = vmatprep.subr.bf16.mxu0 %v246_v6 }
  0x3e   :  { %p333_p13 = por %p332_p12, %p331_p11 }
  0x40   :  { %249 = vmatpush3.bf16.msra.mxu0 %v246_v6  ;;  %p334_p0 = pnand %p333_p13, %p327_p10 }
  0x43   :  { %240 = vmatmul.mubr.msk.f32.vlgmr.msra.gmra.mrb[0].mxu0 %vm71_vm0, %v59_v7 }
 0x116   :  { %v241_v9 = vpop.f32.mrb[0].mxu0 }
 0x117   :  { %v150_v10 = vadd.f32 %v241_v9, %v222_v8  ;;  %v144_v11 = vpop.f32.mrb[1].mxu0 }
 0x118   :  { %v145_v12 = vadd.f32 %v222_v8, %v144_v11 }
 0x119   :  { %154 = vst.msk [vmem:[#allocation8 + $0x8] sm:$0xff] %vm71_vm0, %v150_v10 }
 0x11a   :  { %153 = vst.msk [vmem:[#allocation8] sm:$0xff] %vm71_vm0, %v145_v12  ;;  %165 = vrot.lane.b32.xlu1 %v145_v12, %s406_s8  ;;  %157 = vrot.lane.b32.xlu0 %v145_v12, %s407_s9 }
 0x11b   :  { %337 = shalt.err (!%p334_p0)
}
 0x11c   :  { %s338_s13 = scalar_lea.hbm %s552_s3, 256 }
 0x11d   :  { %p339_p1 = scmp.ne.s32.totalorder %s552_s3, %s338_s13  ;;  %p342_p2 = scmp.lt.u32.totalorder %s338_s13, %s552_s3 }
 0x11f   :  { %p344_p3 = pnand %p342_p2, %p339_p1 }
 0x121   :  { %347 = shalt.err (!%p344_p3)
}
 0x122   :  { %184 = dma.vmem_to_hbm [thread:$0]  %s179_s7, 256, %s552_s3, [#allocation4], %s402_s30, %s402_s30, %s403_s6  }
 0x123   :  { %167 = vrot.lane.b32.xlu1 %v150_v10, %s406_s8  ;;  %159 = vrot.lane.b32.xlu0 %v150_v10, %s407_s9  ;;  %s408_s19 = smov [#allocation9]   ;;  %s409_s22 = smov [#allocation11]  }
 0x124   :  { %s190_s20 = sshll.u32 %s408_s19, 4  ;;  %s202_s23 = sshll.u32 %s409_s22, 4  ;;  %s191_s20 = int_to_ptr.vmem [resolvable:$true] %s190_s20  ;;  %s510_s23 = int_to_ptr.vmem [resolvable:$true] %s202_s23 }
 0x125   :  { %s348_s3 = scalar_lea.vmem %s191_s20, 256  ;;  %p353_p5 = scmp.lt.s32.totalorder %s191_s20, %s191_s20 }
 0x126   :  { %p349_p4 = scmp.ne.s32.totalorder %s191_s20, %s348_s3  ;;  %p354_p6 = scmp.lt.s32.totalorder %s348_s3, %s348_s3 }
 0x128   :  { %p355_p7 = por %p354_p6, %p353_p5 }
 0x12a   :  { %p356_p8 = pnand %p355_p7, %p349_p4 }
 0x18c   :  { %v166_v13 = vpop.permute.xlu1 %165  ;;  %v158_v14 = vpop.permute.xlu0 %157 }
 0x18d   :  { %171 = vst.msk [vmem:[#allocation11] sm:$0xff] %vm71_vm0, %v166_v13  ;;  %163 = vst.msk [vmem:[#allocation9] sm:$0xff] %vm71_vm0, %v158_v14 }
 0x195   :  { %v168_v15 = vpop.permute.xlu1 %167  ;;  %v160_v16 = vpop.permute.xlu0 %159 }
 0x196   :  { %172 = vst.msk [vmem:[#allocation11 + $0x8] sm:$0xff] %vm71_vm0, %v168_v15  ;;  %164 = vst.msk [vmem:[#allocation9 + $0x8] sm:$0xff] %vm71_vm0, %v160_v16 }
 0x197   :  { %359 = shalt.err (!%p356_p8)
}
 0x198   :  { %s360_s26 = scalar_lea.hbm %s553_s4, 256 }
 0x199   :  { %p361_p9 = scmp.ne.s32.totalorder %s553_s4, %s360_s26  ;;  %p364_p10 = scmp.lt.u32.totalorder %s360_s26, %s553_s4 }
 0x19b   :  { %p366_p11 = pnand %p364_p10, %p361_p9 }
 0x19d   :  { %369 = shalt.err (!%p366_p11)
}
 0x19e   :  { %196 = dma.vmem_to_hbm [thread:$0]  %s191_s20, 256, %s553_s4, [#allocation10], %s402_s30, %s402_s30, %s403_s6  }
 0x19f   :  { %s370_s7 = scalar_lea.vmem %s510_s23, 256  ;;  %p375_p13 = scmp.lt.s32.totalorder %s510_s23, %s510_s23 }
 0x1a0   :  { %p371_p12 = scmp.ne.s32.totalorder %s510_s23, %s370_s7  ;;  %p376_p0 = scmp.lt.s32.totalorder %s370_s7, %s370_s7 }
 0x1a2   :  { %p377_p1 = por %p376_p0, %p375_p13 }
 0x1a4   :  { %p378_p2 = pnand %p377_p1, %p371_p12 }
 0x1a6   :  { %381 = shalt.err (!%p378_p2)
}
 0x1a7   :  { %s382_s10 = scalar_lea.hbm %s554_s5, 256 }
 0x1a8   :  { %p383_p3 = scmp.ne.s32.totalorder %s554_s5, %s382_s10  ;;  %p386_p4 = scmp.lt.u32.totalorder %s382_s10, %s554_s5 }
 0x1aa   :  { %p388_p5 = pnand %p386_p4, %p383_p3 }
 0x1ac   :  { %391 = shalt.err (!%p388_p5)
}
 0x1ad   :  { %208 = dma.vmem_to_hbm [thread:$0]  %s510_s23, 256, %s554_s5, [#allocation10], %s402_s30, %s402_s30, %s403_s6  }
 0x1ae   :  { %396 = dma.done.wait [#allocation4], 256  }
 0x1af   :  { %397 = vsyncadd [#allocation4], 4294967040 }
 0x1b0   :  { %398 = dma.done.wait [#allocation10], 512  }
 0x1b1   :  { %399 = vsyncadd [#allocation10], 4294966784 }
 0x1b2   :  { %218 = vsyncpa [#allocation3], 1 }
 0x1b3   :  { %219 = vsyncpa [#allocation6], 1 }
 0x1b4   :  { %220 = vsyncpa [#allocation4], 1 }
 0x1b5   :  { %221 = vsyncpa [#allocation10], 1 }

</bundles_post_ra>
